<compile_context>
chip_gen: v7x
topology: tpu7x:2x2x1
jax: 0.10.0
libtpu: 0.0.40
codegen_flags: <defaults>
</compile_context>

<pallas_src>
import jax
import jax.numpy as jnp
from jax.experimental import pallas as pl
from jax.experimental.pallas import tpu as pltpu


# ----------------------------------------------------------------------------
# Fused kernel: stem conv-as-matmul (K-reduction grid) + epilogue on the last
# K step: ReLU, MaxPool2d(2,2), Linear, BatchNorm1d (affine folded).
# ----------------------------------------------------------------------------
def fused_encoder_kernel(x_ref, w_stem_ref, w_lin_ref, gb_ref, o_ref, acc_ref):
    k = pl.program_id(0)

    @pl.when(k == 0)
    def _init():
        acc_ref[...] = jnp.zeros_like(acc_ref)

    # Stem conv-as-matmul: bf16 operands on the MXU, f32 accumulation.
    acc_ref[...] += jnp.dot(
        x_ref[...], w_stem_ref[...], preferred_element_type=jnp.float32
    )

    @pl.when(k == pl.num_programs(0) - 1)
    def _epilogue():
        n = o_ref.shape[0]                 # batch size (static)
        feats = acc_ref[...]               # (M_pad, C_feat), row index = p*N + n
                                           # (rows >= 4*N are zero padding, never read)

        # MaxPool2d(2, stride=2) over the 2x2 feature map == elementwise max
        # of the 4 patch rows of each image. Chained jnp.maximum is pure VPU
        # lane-parallel work (no cross-sublane XLU reduction). ReLU commutes
        # with max, so applying it after the pool is equivalent.
        pooled = jnp.maximum(
            jnp.maximum(feats[0 * n:1 * n, :], feats[1 * n:2 * n, :]),
            jnp.maximum(feats[2 * n:3 * n, :], feats[3 * n:4 * n, :]),
        )
        pooled = jnp.maximum(pooled, 0.0)  # backbone ReLU, == flatten after pool

        # Linear (bias omitted: a per-column constant is exactly cancelled by
        # the training-mode BatchNorm mean subtraction below).
        z = jnp.dot(
            pooled.astype(jnp.bfloat16), w_lin_ref[...],
            preferred_element_type=jnp.float32,
        )

        # BatchNorm1d (training mode), affine folded into scale/shift.
        # The full batch is resident in this block (the N axis is never
        # tiled), so the statistics are exact. Biased variance, eps = 1e-5,
        # single rsqrt (EUP slot).
        mean = jnp.mean(z, axis=0, keepdims=True)
        zc = z - mean
        var = jnp.mean(zc * zc, axis=0, keepdims=True)
        scale = gb_ref[0:1, :] * jax.lax.rsqrt(var + 1e-5)   # gamma * rsqrt
        shift = gb_ref[1:2, :] - mean * scale                # beta - mean*scale
        o_ref[...] = z * scale + shift


# ----------------------------------------------------------------------------
# Tile-size selection: collapse the K grid whenever the double-buffered
# working set fits comfortably in scoped VMEM (budget conservative enough for
# v5e's 16 MiB default and v7x's 64 MiB physical VMEM).
# ----------------------------------------------------------------------------
def _pick_tk(K, Cf, M_pad, E_pad, budget_bytes=12 * 1024 * 1024):
    resident = (Cf * E_pad * 2          # w_lin (bf16, grid-resident)
                + 2 * E_pad * 4         # gamma/beta
                + M_pad * Cf * 4        # f32 accumulator
                + M_pad * E_pad * 4)    # output block

    def fits(tk):
        streamed = 2 * (M_pad * tk * 2 + tk * Cf * 2)   # double-buffered bf16
        return resident + streamed <= budget_bytes

    if fits(K):
        return K                        # single grid step: no reduction loop
    for cand in (2048, 1024, 512, 256, 128):
        if K % cand == 0 and fits(cand):
            return cand
    return 128


# ----------------------------------------------------------------------------
# EncoderCNN forward
# ----------------------------------------------------------------------------
def encoder_cnn_forward(images, params):
    """images: (N, 3, H, W) float32, NCHW."""
    N, C, H, W = images.shape
    ph, pw = H // 2, W // 2                      # 2x2 grid of patches
    K = C * ph * pw
    Cf = params["w_stem"].shape[1]
    E = params["w_lin"].shape[1]
    E_pad = max(128, ((E + 127) // 128) * 128)   # lane-dense output width

    M = 4 * N
    M_pad = max(16, ((M + 15) // 16) * 16)       # full (16,128) bf16 LHS tiles

    # ---- im2col glue (plain JAX). Cast to bf16 first so the transposed copy
    # moves half the bytes. Rows are ordered (patch, image) so the pooling
    # epilogue can use static contiguous row slices.
    # TODO(synk): express this patch gather via a BlockSpec index_map over a
    # (2, 2) patch grid so no transposed copy of the images is materialized
    # (only matters at real backbone input sizes; in-kernel reshape of the
    # non-lane-aligned (ph, pw) minor dims is the blocker).
    x = images.astype(jnp.bfloat16).reshape(N, C, 2, ph, 2, pw)
    x = jnp.transpose(x, (2, 4, 0, 1, 3, 5))         # (2, 2, N, C, ph, pw)
    patches = x.reshape(M, K)                        # (P*N, K), row = p*N + n
    if M_pad != M:
        patches = jnp.pad(patches, ((0, M_pad - M), (0, 0)))

    w_stem = params["w_stem"].astype(jnp.bfloat16)   # (K, Cf)

    def pad_lanes(a):
        return jnp.pad(a, [(0, 0)] * (a.ndim - 1) + [(0, E_pad - E)])

    w_lin = pad_lanes(params["w_lin"]).astype(jnp.bfloat16)        # (Cf, E_pad)
    gb = jnp.concatenate(
        [pad_lanes(params["gamma"]), pad_lanes(params["beta"])], axis=0
    )                                                              # (2, E_pad)

    tk = _pick_tk(K, Cf, M_pad, E_pad)
    assert K % tk == 0, (K, tk)
    grid = (K // tk,)

    cost = pl.CostEstimate(
        flops=2 * M_pad * K * Cf + 2 * M_pad * Cf * E_pad,
        transcendentals=E_pad,
        bytes_accessed=(M_pad * K * 2 + K * Cf * 2 + Cf * E_pad * 2
                        + 2 * E_pad * 4 + N * E_pad * 4),
    )

    # `features = Variable(features.data)` is a detach; it has no effect on the
    # forward values, so it is not reproduced here (forward-only).
    out = pl.pallas_call(
        fused_encoder_kernel,
        out_shape=jax.ShapeDtypeStruct((N, E_pad), jnp.float32),
        grid_spec=pltpu.PrefetchScalarGridSpec(
            num_scalar_prefetch=0,
            grid=grid,
            in_specs=[
                pl.BlockSpec((M_pad, tk), lambda k: (0, k)),      # patches
                pl.BlockSpec((tk, Cf), lambda k: (k, 0)),         # w_stem
                pl.BlockSpec((Cf, E_pad), lambda k: (0, 0)),      # w_lin (resident)
                pl.BlockSpec((2, E_pad), lambda k: (0, 0)),       # gamma/beta packed
            ],
            out_specs=pl.BlockSpec((N, E_pad), lambda k: (0, 0)),
            scratch_shapes=[pltpu.VMEM((M_pad, Cf), jnp.float32)],
        ),
        compiler_params=pltpu.CompilerParams(
            # Single grid axis is the K reduction -> must be "arbitrary".
            dimension_semantics=("arbitrary",),
        ),
        cost_estimate=cost,
    )(patches, w_stem, w_lin, gb)

    return out[:, :E]


def init_params(key, in_channels, patch_h, patch_w, feat_dim, embed_size):
    k_stem, k_lin = jax.random.split(key)
    K = in_channels * patch_h * patch_w
    # Stand-in backbone weights (deterministic).
    w_stem = jax.random.normal(k_stem, (K, feat_dim), jnp.float32) * 0.05
    # self.linear.weight.data.normal_(0.0, 0.02); self.linear.bias.data.fill_(0)
    # The bias is omitted: it is initialized to zero AND any per-column bias is
    # exactly cancelled by the training-mode BatchNorm mean subtraction.
    w_lin = jax.random.normal(k_lin, (feat_dim, embed_size), jnp.float32) * 0.02
    # nn.BatchNorm1d default affine init: gamma=1, beta=0.
    gamma = jnp.ones((1, embed_size), jnp.float32)
    beta = jnp.zeros((1, embed_size), jnp.float32)
    return {
        "w_stem": w_stem,
        "w_lin": w_lin,
        "gamma": gamma,
        "beta": beta,
    }


if __name__ == "__main__":
    # Small shapes consistent with the forward pass:
    #   images (N=2, 3, 32, 32) -> backbone features (2, 256, 2, 2)
    #   -> maxpool (2, 256, 1, 1) -> flatten (2, 256) -> linear+bn (2, 32)
    N, C, H, W = 2, 3, 32, 32
    feat_dim = 256      # stands in for resnet.fc.in_features (=2048 in real net)
    embed_size = 32

    key = jax.random.PRNGKey(0)
    k_img, k_par = jax.random.split(key)
    images = jax.random.normal(k_img, (N, C, H, W), jnp.float32)
    params = init_params(k_par, C, H // 2, W // 2, feat_dim, embed_size)

    fwd = jax.jit(encoder_cnn_forward)
    out = jax.block_until_ready(fwd(images, params))

    assert out.shape == (N, embed_size), out.shape
    assert out.dtype == jnp.float32, out.dtype
    assert bool(jnp.all(jnp.isfinite(out)))
    print("KERNEL_OK")
</pallas_src>

<mosaic_0001>
module attributes {stable_mosaic.version = 11 : i64} {
  func.func @fused_encoder_kernel(%arg0: i32, %arg1: memref<16x768xbf16, #tpu.memory_space<vmem>>, %arg2: memref<768x256xbf16, #tpu.memory_space<vmem>>, %arg3: memref<256x128xbf16, #tpu.memory_space<vmem>>, %arg4: memref<2x128xf32, #tpu.memory_space<vmem>>, %arg5: memref<2x128xf32, #tpu.memory_space<vmem>>, %arg6: memref<16x256xf32, #tpu.memory_space<vmem>>) attributes {dimension_semantics = [#tpu.dimension_semantics<arbitrary>], iteration_bounds = array<i64: 1>, scalar_prefetch = 0 : i64, scratch_operands = 1 : i64, tpu.core_type = #tpu.core_type<tc>, window_params = [{transform_indices = @transform_0, window_bounds = array<i64: 16, 768>}, {transform_indices = @transform_1, window_bounds = array<i64: 768, 256>}, {pipeline_mode = #tpu.pipeline_mode<synchronous>, transform_indices = @transform_2, window_bounds = array<i64: 256, 128>}, {pipeline_mode = #tpu.pipeline_mode<synchronous>, transform_indices = @transform_3, window_bounds = array<i64: 2, 128>}, {pipeline_mode = #tpu.pipeline_mode<synchronous>, transform_indices = @transform_4, window_bounds = array<i64: 2, 128>}]} {
    %c0_i32 = arith.constant 0 : i32
    %0 = arith.cmpi eq, %arg0, %c0_i32 : i32
    %1 = arith.extui %0 : i1 to i32
    %c0_i32_0 = arith.constant 0 : i32
    %2 = arith.cmpi ne, %1, %c0_i32_0 : i32
    scf.if %2 {
      %cst_10 = arith.constant 0.000000e+00 : f32
      %12 = vector.broadcast %cst_10 : f32 to vector<16x256xf32>
      %c0_11 = arith.constant 0 : index
      %c0_12 = arith.constant 0 : index
      %13 = vector.load %arg6[%c0_11, %c0_12] : memref<16x256xf32, #tpu.memory_space<vmem>>, vector<16x256xf32>
      tpu.vector_store %arg6[%c0_11, %c0_12], %12 {strides = array<i32>} : memref<16x256xf32, #tpu.memory_space<vmem>>, vector<16x256xf32>,
    } else {
    }
    %c0 = arith.constant 0 : index
    %c0_1 = arith.constant 0 : index
    %3 = vector.load %arg6[%c0, %c0_1] : memref<16x256xf32, #tpu.memory_space<vmem>>, vector<16x256xf32>
    %c0_2 = arith.constant 0 : index
    %c0_3 = arith.constant 0 : index
    %4 = vector.load %arg1[%c0_2, %c0_3] : memref<16x768xbf16, #tpu.memory_space<vmem>>, vector<16x768xbf16>
    %c0_4 = arith.constant 0 : index
    %c0_5 = arith.constant 0 : index
    %5 = vector.load %arg2[%c0_4, %c0_5] : memref<768x256xbf16, #tpu.memory_space<vmem>>, vector<768x256xbf16>
    %cst = arith.constant dense<0.000000e+00> : vector<16x256xf32>
    %6 = tpu.matmul %4, %5, %cst {dimension_numbers = #tpu.dot_dimension_numbers<[1], [0], [0], [1], [0, 0, 1, 1], [], []>} : vector<16x768xbf16>, vector<768x256xbf16>, vector<16x256xf32> -> vector<16x256xf32>
    %7 = arith.addf %3, %6 : vector<16x256xf32>
    %c0_6 = arith.constant 0 : index
    %c0_7 = arith.constant 0 : index
    %8 = vector.load %arg6[%c0_6, %c0_7] : memref<16x256xf32, #tpu.memory_space<vmem>>, vector<16x256xf32>
    tpu.vector_store %arg6[%c0_6, %c0_7], %7 {strides = array<i32>} : memref<16x256xf32, #tpu.memory_space<vmem>>, vector<16x256xf32>,
    %c0_i32_8 = arith.constant 0 : i32
    %9 = arith.cmpi eq, %arg0, %c0_i32_8 : i32
    %10 = arith.extui %9 : i1 to i32
    %c0_i32_9 = arith.constant 0 : i32
    %11 = arith.cmpi ne, %10, %c0_i32_9 : i32
    scf.if %11 {
      %c0_10 = arith.constant 0 : index
      %c0_11 = arith.constant 0 : index
      %12 = vector.load %arg6[%c0_10, %c0_11] : memref<16x256xf32, #tpu.memory_space<vmem>>, vector<16x256xf32>
      %13 = vector.extract_strided_slice %12 {offsets = [0, 0], sizes = [2, 256], strides = [1, 1]} : vector<16x256xf32> to vector<2x256xf32>
      %14 = vector.extract_strided_slice %12 {offsets = [2, 0], sizes = [2, 256], strides = [1, 1]} : vector<16x256xf32> to vector<2x256xf32>
      %15 = arith.maximumf %13, %14 : vector<2x256xf32>
      %16 = vector.extract_strided_slice %12 {offsets = [4, 0], sizes = [2, 256], strides = [1, 1]} : vector<16x256xf32> to vector<2x256xf32>
      %17 = vector.extract_strided_slice %12 {offsets = [6, 0], sizes = [2, 256], strides = [1, 1]} : vector<16x256xf32> to vector<2x256xf32>
      %18 = arith.maximumf %16, %17 : vector<2x256xf32>
      %19 = arith.maximumf %15, %18 : vector<2x256xf32>
      %cst_12 = arith.constant 0.000000e+00 : f32
      %20 = vector.broadcast %cst_12 : f32 to vector<2x256xf32>
      %21 = arith.maximumf %19, %20 : vector<2x256xf32>
      %22 = arith.truncf %21 : vector<2x256xf32> to vector<2x256xbf16>
      %c0_13 = arith.constant 0 : index
      %c0_14 = arith.constant 0 : index
      %23 = vector.load %arg3[%c0_13, %c0_14] : memref<256x128xbf16, #tpu.memory_space<vmem>>, vector<256x128xbf16>
      %cst_15 = arith.constant dense<0.000000e+00> : vector<2x128xf32>
      %24 = tpu.matmul %22, %23, %cst_15 {dimension_numbers = #tpu.dot_dimension_numbers<[1], [0], [0], [1], [0, 0, 1, 1], [], []>} : vector<2x256xbf16>, vector<256x128xbf16>, vector<2x128xf32> -> vector<2x128xf32>
      %cst_16 = arith.constant dense<0.000000e+00> : vector<128xf32>
      %25 = vector.multi_reduction <add>, %24, %cst_16 [0] : vector<2x128xf32> to vector<128xf32>
      %26 = vector.shape_cast %25 : vector<128xf32> to vector<1x128xf32>
      %cst_17 = arith.constant 2.000000e+00 : f32
      %27 = vector.broadcast %cst_17 : f32 to vector<1x128xf32>
      %28 = arith.divf %26, %27 : vector<1x128xf32>
      %29 = vector.broadcast %28 : vector<1x128xf32> to vector<2x128xf32>
      %30 = arith.subf %24, %29 : vector<2x128xf32>
      %31 = arith.mulf %30, %30 : vector<2x128xf32>
      %cst_18 = arith.constant dense<0.000000e+00> : vector<128xf32>
      %32 = vector.multi_reduction <add>, %31, %cst_18 [0] : vector<2x128xf32> to vector<128xf32>
      %33 = vector.shape_cast %32 : vector<128xf32> to vector<1x128xf32>
      %cst_19 = arith.constant 2.000000e+00 : f32
      %34 = vector.broadcast %cst_19 : f32 to vector<1x128xf32>
      %35 = arith.divf %33, %34 : vector<1x128xf32>
      %c0_20 = arith.constant 0 : index
      %c0_21 = arith.constant 0 : index
      %36 = vector.load %arg4[%c0_20, %c0_21] : memref<2x128xf32, #tpu.memory_space<vmem>>, vector<1x128xf32>
      %cst_22 = arith.constant 9.99999974E-6 : f32
      %37 = vector.broadcast %cst_22 : f32 to vector<1x128xf32>
      %38 = arith.addf %35, %37 : vector<1x128xf32>
      %39 = math.rsqrt %38 : vector<1x128xf32>
      %40 = arith.mulf %36, %39 : vector<1x128xf32>
      %c1 = arith.constant 1 : index
      %c0_23 = arith.constant 0 : index
      %41 = vector.load %arg4[%c1, %c0_23] : memref<2x128xf32, #tpu.memory_space<vmem>>, vector<1x128xf32>
      %42 = arith.mulf %28, %40 : vector<1x128xf32>
      %43 = arith.subf %41, %42 : vector<1x128xf32>
      %44 = vector.broadcast %40 : vector<1x128xf32> to vector<2x128xf32>
      %45 = arith.mulf %24, %44 : vector<2x128xf32>
      %46 = vector.broadcast %43 : vector<1x128xf32> to vector<2x128xf32>
      %47 = arith.addf %45, %46 : vector<2x128xf32>
      %c0_24 = arith.constant 0 : index
      %c0_25 = arith.constant 0 : index
      %48 = vector.load %arg5[%c0_24, %c0_25] : memref<2x128xf32, #tpu.memory_space<vmem>>, vector<2x128xf32>
      tpu.vector_store %arg5[%c0_24, %c0_25], %47 {strides = array<i32>} : memref<2x128xf32, #tpu.memory_space<vmem>>, vector<2x128xf32>,
    } else {
    }
    return
  }
  func.func @transform_0(%arg0: i32) -> (i32, i32) {
    %c0_i32 = arith.constant 0 : i32
    %c0_i32_0 = arith.constant 0 : i32
    return %c0_i32, %arg0 : i32, i32
  }
  func.func @transform_1(%arg0: i32) -> (i32, i32) {
    %c0_i32 = arith.constant 0 : i32
    %c0_i32_0 = arith.constant 0 : i32
    return %arg0, %c0_i32 : i32, i32
  }
  func.func @transform_2(%arg0: i32) -> (i32, i32) {
    %c0_i32 = arith.constant 0 : i32
    %c0_i32_0 = arith.constant 0 : i32
    %c0_i32_1 = arith.constant 0 : i32
    return %c0_i32, %c0_i32_0 : i32, i32
  }
  func.func @transform_3(%arg0: i32) -> (i32, i32) {
    %c0_i32 = arith.constant 0 : i32
    %c0_i32_0 = arith.constant 0 : i32
    %c0_i32_1 = arith.constant 0 : i32
    return %c0_i32, %c0_i32_0 : i32, i32
  }
  func.func @transform_4(%arg0: i32) -> (i32, i32) {
    %c0_i32 = arith.constant 0 : i32
    %c0_i32_0 = arith.constant 0 : i32
    %c0_i32_1 = arith.constant 0 : i32
    return %c0_i32, %c0_i32_0 : i32, i32
  }
}

</mosaic_0001>

<bundles_post_ra>
// kernel: encoder_cnn_forward.1
= control target key start
LH: loop header
LB: loop body
LE: loop exit
PB: predicated region body
PF: predicated region fallthrough
CT: control target
= control target key end

     0   :  { %s1765_s0 = inlined_call_operand.vmem [shape: bf16[16,768], index: 0, kind: input, shape index: {}]   ;;  %s1766_s1 = inlined_call_operand.vmem [shape: bf16[768,256], index: 1, kind: input, shape index: {}]   ;;  %s1767_s2 = inlined_call_operand.vmem [shape: bf16[256,128], index: 2, kind: input, shape index: {}]   ;;  %s1768_s3 = inlined_call_operand.vmem [shape: f32[2,128], index: 3, kind: input, shape index: {}]   ;;  %s1769_s4 = inlined_call_operand.hbm [shape: f32[2,128], index: 4, kind: output, shape index: {}]  }
   0x1   :  { %v1172_v0 = vld [vmem:[%s1766_s1 + $0x104] ss:$8 sps:$4 sm:$0xff]   ;;  %v1174_v1 = vld [vmem:[%s1766_s1 + $0x100] ss:$8 sps:$4 sm:$0xff]   ;;  %v1175_v2 = vld [vmem:[%s1766_s1 + $0x114] ss:$8 sps:$4 sm:$0xff]  }
   0x2   :  { %686 = vmatprep.subr.bf16.mxu0 %v1172_v0  ;;  %v1177_v3 = vld [vmem:[%s1766_s1 + $0x110] ss:$8 sps:$4 sm:$0xff]   ;;  %v1178_v4 = vld [vmem:[%s1766_s1 + $0x124] ss:$8 sps:$4 sm:$0xff]   ;;  %v1180_v5 = vld [vmem:[%s1766_s1 + $0x120] ss:$8 sps:$4 sm:$0xff]  }
   0x3   :  { %687 = vmatpush1.bf16.msra.mxu0 %v1174_v1  ;;  %v1181_v6 = vld [vmem:[%s1766_s1 + $0x134] ss:$8 sps:$4 sm:$0xff]   ;;  %v1183_v7 = vld [vmem:[%s1766_s1 + $0x130] ss:$8 sps:$4 sm:$0xff]   ;;  %v1184_v8 = vld [vmem:[%s1766_s1 + $0x144] ss:$8 sps:$4 sm:$0xff]  }
   0x4   :  { %688 = vmatprep.subr.bf16.mxu0 %v1175_v2  ;;  %v1186_v9 = vld [vmem:[%s1766_s1 + $0x140] ss:$8 sps:$4 sm:$0xff]   ;;  %v1187_v10 = vld [vmem:[%s1766_s1 + $0x154] ss:$8 sps:$4 sm:$0xff]   ;;  %v1189_v11 = vld [vmem:[%s1766_s1 + $0x150] ss:$8 sps:$4 sm:$0xff]  }
   0x5   :  { %v1190_v12 = vld [vmem:[%s1766_s1 + $0x164] ss:$8 sps:$4 sm:$0xff]   ;;  %v1222_v14 = vld [vmem:[%s1766_s1] ss:$8 sps:$4 sm:$0xff]   ;;  %v1193_v17 = vld [vmem:[%s1766_s1 + $0x174] ss:$8 sps:$4 sm:$0xff]  }
   0x6   :  { %v1219_v13 = vld [vmem:[%s1766_s1 + $0x4] ss:$8 sps:$4 sm:$0xff]   ;;  %v1192_v15 = vld [vmem:[%s1766_s1 + $0x160] ss:$8 sps:$4 sm:$0xff]   ;;  %v1229_v18 = vld [vmem:[%s1766_s1 + $0x14] ss:$8 sps:$4 sm:$0xff]  }
   0x7   :  { %689 = vmatpush1.bf16.msra.mxu0 %v1177_v3  ;;  %643 = vmatprep.subr.bf16.mxu1 %v1219_v13  ;;  %v1225_v16 = vld [vmem:[%s1765_s0 + $0xc] ss:$24 sps:$4 sm:$0xff]   ;;  %v1231_v19 = vld [vmem:[%s1766_s1 + $0x10] ss:$8 sps:$4 sm:$0xff]   ;;  %v1237_v23 = vld [vmem:[%s1766_s1 + $0x20] ss:$8 sps:$4 sm:$0xff]  }
   0x8   :  { %690 = vmatprep.subr.bf16.mxu0 %v1178_v4  ;;  %644 = vmatpush1.bf16.msra.mxu1 %v1222_v14  ;;  %v1195_v20 = vld [vmem:[%s1766_s1 + $0x170] ss:$8 sps:$4 sm:$0xff]   ;;  %v1196_v21 = vld [vmem:[%s1766_s1 + $0x184] ss:$8 sps:$4 sm:$0xff]   ;;  %v1198_v24 = vld [vmem:[%s1766_s1 + $0x180] ss:$8 sps:$4 sm:$0xff]  }
   0x9   :  { %718 = vmatprep.mubr.bf16.mxu0 %v1225_v16  ;;  %645 = vmatprep.subr.bf16.mxu1 %v1229_v18  ;;  %v1235_v22 = vld [vmem:[%s1766_s1 + $0x24] ss:$8 sps:$4 sm:$0xff]   ;;  %v1241_v25 = vld [vmem:[%s1766_s1 + $0x34] ss:$8 sps:$4 sm:$0xff]   ;;  %v1243_v27 = vld [vmem:[%s1766_s1 + $0x30] ss:$8 sps:$4 sm:$0xff]  }
   0xa   :  { %v1199_v26 = vld [vmem:[%s1766_s1 + $0x194] ss:$8 sps:$4 sm:$0xff]   ;;  %v1247_v28 = vld [vmem:[%s1766_s1 + $0x44] ss:$8 sps:$4 sm:$0xff]   ;;  %v1201_v29 = vld [vmem:[%s1766_s1 + $0x190] ss:$8 sps:$4 sm:$0xff]  }
   0xb   :  { %691 = vmatpush1.bf16.msra.mxu0 %v1180_v5  ;;  %v1202_v30 = vld [vmem:[%s1766_s1 + $0x1a4] ss:$8 sps:$4 sm:$0xff]   ;;  %v1249_v31 = vld [vmem:[%s1766_s1 + $0x40] ss:$8 sps:$4 sm:$0xff]   ;;  %v1253_v32 = vld [vmem:[%s1766_s1 + $0x54] ss:$8 sps:$4 sm:$0xff]  }
   0xc   :  { %692 = vmatprep.subr.bf16.mxu0 %v1181_v6  ;;  %646 = vmatpush1.bf16.msra.mxu1 %v1231_v19  ;;  %v1204_v33 = vld [vmem:[%s1766_s1 + $0x1a0] ss:$8 sps:$4 sm:$0xff]   ;;  %v1205_v34 = vld [vmem:[%s1766_s1 + $0x1b4] ss:$8 sps:$4 sm:$0xff]   ;;  %v1255_v35 = vld [vmem:[%s1766_s1 + $0x50] ss:$8 sps:$4 sm:$0xff]  }
   0xd   :  { %647 = vmatprep.subr.bf16.mxu1 %v1235_v22  ;;  %v1259_v36 = vld [vmem:[%s1766_s1 + $0x64] ss:$8 sps:$4 sm:$0xff]   ;;  %v1207_v37 = vld [vmem:[%s1766_s1 + $0x1b0] ss:$8 sps:$4 sm:$0xff]   ;;  %v1261_v39 = vld [vmem:[%s1766_s1 + $0x60] ss:$8 sps:$4 sm:$0xff]  }
   0xe   :  { %v1208_v38 = vld [vmem:[%s1766_s1 + $0x1c4] ss:$8 sps:$4 sm:$0xff]   ;;  %v1265_v40 = vld [vmem:[%s1766_s1 + $0x74] ss:$8 sps:$4 sm:$0xff]   ;;  %v1210_v41 = vld [vmem:[%s1766_s1 + $0x1c0] ss:$8 sps:$4 sm:$0xff]  }
   0xf   :  { %693 = vmatpush1.bf16.msra.mxu0 %v1183_v7  ;;  %v1211_v42 = vld [vmem:[%s1766_s1 + $0x1d4] ss:$8 sps:$4 sm:$0xff]   ;;  %v1267_v43 = vld [vmem:[%s1766_s1 + $0x70] ss:$8 sps:$4 sm:$0xff]   ;;  %v1271_v44 = vld [vmem:[%s1766_s1 + $0x84] ss:$8 sps:$4 sm:$0xff]  }
  0x10   :  { %694 = vmatprep.subr.bf16.mxu0 %v1184_v8  ;;  %648 = vmatpush1.bf16.msra.mxu1 %v1237_v23  ;;  %v1213_v45 = vld [vmem:[%s1766_s1 + $0x1d0] ss:$8 sps:$4 sm:$0xff]   ;;  %v1214_v46 = vld [vmem:[%s1766_s1 + $0x1e4] ss:$8 sps:$4 sm:$0xff]   ;;  %v1273_v47 = vld [vmem:[%s1766_s1 + $0x80] ss:$8 sps:$4 sm:$0xff]  }
  0x11   :  { %649 = vmatprep.subr.bf16.mxu1 %v1241_v25  ;;  %v1277_v48 = vld [vmem:[%s1766_s1 + $0x94] ss:$8 sps:$4 sm:$0xff]   ;;  %v1216_v49 = vld [vmem:[%s1766_s1 + $0x1e0] ss:$8 sps:$4 sm:$0xff]   ;;  %v1279_v51 = vld [vmem:[%s1766_s1 + $0x90] ss:$8 sps:$4 sm:$0xff]  }
  0x12   :  { %v1217_v50 = vld [vmem:[%s1766_s1 + $0x1f4] ss:$8 sps:$4 sm:$0xff]   ;;  %v1283_v52 = vld [vmem:[%s1766_s1 + $0xa4] ss:$8 sps:$4 sm:$0xff]   ;;  %v1221_v53 = vld [vmem:[%s1766_s1 + $0x1f0] ss:$8 sps:$4 sm:$0xff]  }
  0x13   :  { %695 = vmatpush1.bf16.msra.mxu0 %v1186_v9  ;;  %v1228_v54 = vld [vmem:[%s1766_s1 + $0x204] ss:$8 sps:$4 sm:$0xff]   ;;  %v1285_v55 = vld [vmem:[%s1766_s1 + $0xa0] ss:$8 sps:$4 sm:$0xff]   ;;  %v1289_v57 = vld [vmem:[%s1766_s1 + $0xb4] ss:$8 sps:$4 sm:$0xff]  }
  0x14   :  { %696 = vmatprep.subr.bf16.mxu0 %v1187_v10  ;;  %650 = vmatpush1.bf16.msra.mxu1 %v1243_v27  ;;  %v1223_v56 = vld [vmem:[%s1765_s0 + $0x8] ss:$24 sps:$4 sm:$0xff]   ;;  %v1234_v59 = vld [vmem:[%s1766_s1 + $0x214] ss:$8 sps:$4 sm:$0xff]   ;;  %v1291_v60 = vld [vmem:[%s1766_s1 + $0xb0] ss:$8 sps:$4 sm:$0xff]  }
  0x15   :  { %651 = vmatprep.subr.bf16.mxu1 %v1247_v28  ;;  %v1226_v58 = vld [vmem:[%s1766_s1 + $0x200] ss:$8 sps:$4 sm:$0xff]   ;;  %v1318_v61 = vld [vmem:[%s1765_s0 + $0x4] ss:$24 sps:$4 sm:$0xff]   ;;  %v1232_v63 = vld [vmem:[%s1766_s1 + $0x210] ss:$8 sps:$4 sm:$0xff]  }
  0x16   :  { %v1295_v62 = vld [vmem:[%s1766_s1 + $0xc4] ss:$8 sps:$4 sm:$0xff]   ;;  %675 = vmatprep.mubr.bf16.mxu1 %v1318_v61  ;;  %v1238_v2 = vld [vmem:[%s1766_s1 + $0x220] ss:$8 sps:$4 sm:$0xff]   ;;  %v1301_v4 = vld [vmem:[%s1766_s1 + $0xd4] ss:$8 sps:$4 sm:$0xff]  }
  0x17   :  { %697 = vmatpush1.bf16.msra.mxu0 %v1189_v11  ;;  %v1324_v0 = vld [vmem:[%s1765_s0 + $0x14] ss:$24 sps:$4 sm:$0xff]   ;;  %v1297_v3 = vld [vmem:[%s1766_s1 + $0xc0] ss:$8 sps:$4 sm:$0xff]   ;;  %v1303_v6 = vld [vmem:[%s1766_s1 + $0xd0] ss:$8 sps:$4 sm:$0xff]  }
  0x18   :  { %698 = vmatprep.subr.bf16.mxu0 %v1190_v12  ;;  %652 = vmatpush1.bf16.msra.mxu1 %v1249_v31  ;;  %v1240_v1 = vld [vmem:[%s1766_s1 + $0x224] ss:$8 sps:$4 sm:$0xff]   ;;  %v1246_v5 = vld [vmem:[%s1766_s1 + $0x234] ss:$8 sps:$4 sm:$0xff]   ;;  %v1244_v7 = vld [vmem:[%s1766_s1 + $0x230] ss:$8 sps:$4 sm:$0xff]  }
  0x19   :  { %653 = vmatprep.subr.bf16.mxu1 %v1253_v32  ;;  %v1307_v8 = vld [vmem:[%s1766_s1 + $0xe4] ss:$8 sps:$4 sm:$0xff]   ;;  %v1309_v10 = vld [vmem:[%s1766_s1 + $0xe0] ss:$8 sps:$4 sm:$0xff]   ;;  %v1313_v11 = vld [vmem:[%s1766_s1 + $0xf4] ss:$8 sps:$4 sm:$0xff]  }
  0x1a   :  { %v1252_v9 = vld [vmem:[%s1766_s1 + $0x244] ss:$8 sps:$4 sm:$0xff]   ;;  %v1250_v12 = vld [vmem:[%s1766_s1 + $0x240] ss:$8 sps:$4 sm:$0xff]   ;;  %v1258_v13 = vld [vmem:[%s1766_s1 + $0x254] ss:$8 sps:$4 sm:$0xff]  }
  0x1b   :  { %699 = vmatpush1.bf16.msra.mxu0 %v1192_v15 }
  0x1c   :  { %700 = vmatprep.subr.bf16.mxu0 %v1193_v17  ;;  %654 = vmatpush1.bf16.msra.mxu1 %v1255_v35 }
  0x1d   :  { %655 = vmatprep.subr.bf16.mxu1 %v1259_v36 }
  0x1f   :  { %701 = vmatpush1.bf16.msra.mxu0 %v1195_v20 }
  0x20   :  { %702 = vmatprep.subr.bf16.mxu0 %v1196_v21  ;;  %656 = vmatpush1.bf16.msra.mxu1 %v1261_v39 }
  0x21   :  { %657 = vmatprep.subr.bf16.mxu1 %v1265_v40 }
  0x23   :  { %703 = vmatpush1.bf16.msra.mxu0 %v1198_v24 }
  0x24   :  { %704 = vmatprep.subr.bf16.mxu0 %v1199_v26  ;;  %658 = vmatpush1.bf16.msra.mxu1 %v1267_v43 }
  0x25   :  { %659 = vmatprep.subr.bf16.mxu1 %v1271_v44 }
  0x27   :  { %705 = vmatpush1.bf16.msra.mxu0 %v1201_v29 }
  0x28   :  { %706 = vmatprep.subr.bf16.mxu0 %v1202_v30  ;;  %660 = vmatpush1.bf16.msra.mxu1 %v1273_v47 }
  0x29   :  { %661 = vmatprep.subr.bf16.mxu1 %v1277_v48 }
  0x2b   :  { %707 = vmatpush1.bf16.msra.mxu0 %v1204_v33 }
  0x2c   :  { %708 = vmatprep.subr.bf16.mxu0 %v1205_v34  ;;  %662 = vmatpush1.bf16.msra.mxu1 %v1279_v51 }
  0x2d   :  { %663 = vmatprep.subr.bf16.mxu1 %v1283_v52 }
  0x2f   :  { %709 = vmatpush1.bf16.msra.mxu0 %v1207_v37 }
  0x30   :  { %710 = vmatprep.subr.bf16.mxu0 %v1208_v38  ;;  %664 = vmatpush1.bf16.msra.mxu1 %v1285_v55 }
  0x31   :  { %665 = vmatprep.subr.bf16.mxu1 %v1289_v57 }
  0x33   :  { %711 = vmatpush1.bf16.msra.mxu0 %v1210_v41 }
  0x34   :  { %712 = vmatprep.subr.bf16.mxu0 %v1211_v42  ;;  %666 = vmatpush1.bf16.msra.mxu1 %v1291_v60 }
  0x35   :  { %667 = vmatprep.subr.bf16.mxu1 %v1295_v62 }
  0x37   :  { %713 = vmatpush1.bf16.msra.mxu0 %v1213_v45 }
  0x38   :  { %714 = vmatprep.subr.bf16.mxu0 %v1214_v46  ;;  %668 = vmatpush1.bf16.msra.mxu1 %v1297_v3 }
  0x39   :  { %669 = vmatprep.subr.bf16.mxu1 %v1301_v4 }
  0x3b   :  { %715 = vmatpush1.bf16.msra.mxu0 %v1216_v49 }
  0x3c   :  { %716 = vmatprep.subr.bf16.mxu0 %v1217_v50  ;;  %670 = vmatpush1.bf16.msra.mxu1 %v1303_v6 }
  0x3d   :  { %671 = vmatprep.subr.bf16.mxu1 %v1307_v8 }
  0x3f   :  { %717 = vmatpush1.bf16.msra.mxu0 %v1221_v53 }
  0x40   :  { %729 = vmatprep.subr.bf16.mxu0 %v1228_v54 }
  0x42   :  { %719 = vmatmul.mubr.bf16.vlgmr.msra.gmra.mrb[0].mxu0 %v1223_v56 }
  0x43   :  { %730 = vmatpush1.bf16.msra.mxu0 %v1226_v58  ;;  %761 = vmatprep.mubr.bf16.mxu0 %v1324_v0 }
  0x44   :  { %731 = vmatprep.subr.bf16.mxu0 %v1234_v59 }
  0x47   :  { %732 = vmatpush1.bf16.msra.mxu0 %v1232_v63 }
  0x48   :  { %733 = vmatprep.subr.bf16.mxu0 %v1240_v1 }
  0x4b   :  { %734 = vmatpush1.bf16.msra.mxu0 %v1238_v2 }
  0x4c   :  { %735 = vmatprep.subr.bf16.mxu0 %v1246_v5 }
  0x4f   :  { %736 = vmatpush1.bf16.msra.mxu0 %v1244_v7 }
  0x50   :  { %737 = vmatprep.subr.bf16.mxu0 %v1252_v9 }
  0x51   :  { %9 = vsyncpa [#allocation4], 0  ;;  %672 = vmatpush1.bf16.msra.mxu1 %v1309_v10  ;;  %v1315_v14 = vld [vmem:[%s1766_s1 + $0xf0] ss:$8 sps:$4 sm:$0xff]   ;;  %v1325_v15 = vld [vmem:[%s1767_s2 + $0x40] sm:$0xff]   ;;  %vm973_vm0 = vcmask 1041408  }
  0x52   :  { %673 = vmatprep.subr.bf16.mxu1 %v1313_v11  ;;  %v1256_v16 = vld [vmem:[%s1766_s1 + $0x250] ss:$8 sps:$4 sm:$0xff]   ;;  %v1264_v17 = vld [vmem:[%s1766_s1 + $0x264] ss:$8 sps:$4 sm:$0xff]   ;;  %v1262_v21 = vld [vmem:[%s1766_s1 + $0x260] ss:$8 sps:$4 sm:$0xff]  }
  0x53   :  { %738 = vmatpush1.bf16.msra.mxu0 %v1250_v12  ;;  %v1316_v18 = vld [vmem:[%s1765_s0] ss:$24 sps:$4 sm:$0xff]   ;;  %v1327_v20 = vld [vmem:[%s1767_s2 + $0x48] sm:$0xff]   ;;  %v1270_v22 = vld [vmem:[%s1766_s1 + $0x274] ss:$8 sps:$4 sm:$0xff]   ;;  %s1367_s18 = smov [#allocation3]  }
  0x54   :  { %739 = vmatprep.subr.bf16.mxu0 %v1258_v13  ;;  %v1326_v19 = vld [vmem:[%s1767_s2] sm:$0xff]   ;;  %v1328_v23 = vld [vmem:[%s1767_s2 + $0x8] sm:$0xff]   ;;  %v1329_v24 = vld [vmem:[%s1767_s2 + $0x50] sm:$0xff]   ;;  %s1017_s19 = sshll.u32 %s1367_s18, 4  ;;  %s1018_s19 = int_to_ptr.vmem [resolvable:$true] %s1017_s19 }
  0x55   :  { %674 = vmatpush1.bf16.msra.mxu1 %v1315_v14  ;;  %v1268_v25 = vld [vmem:[%s1766_s1 + $0x270] ss:$8 sps:$4 sm:$0xff]   ;;  %v1276_v26 = vld [vmem:[%s1766_s1 + $0x284] ss:$8 sps:$4 sm:$0xff]   ;;  %v1274_v28 = vld [vmem:[%s1766_s1 + $0x280] ss:$8 sps:$4 sm:$0xff]   ;;  %p1348_p1 = scmp.lt.s32.totalorder %s1018_s19, %s1018_s19 }
  0x56   :  { %1143 = vmatprep.subr.bf16.mxu1 %v1325_v15  ;;  %v1330_v27 = vld [vmem:[%s1767_s2 + $0x10] sm:$0xff]   ;;  %v1288_v31 = vld [vmem:[%s1766_s1 + $0x2a4] ss:$8 sps:$4 sm:$0xff]   ;;  %v1286_v32 = vld [vmem:[%s1766_s1 + $0x2a0] ss:$8 sps:$4 sm:$0xff]   ;;  %s1343_s20 = scalar_lea.vmem %s1018_s19, 32 }
  0x57   :  { %740 = vmatpush1.bf16.msra.mxu0 %v1256_v16  ;;  %v1282_v29 = vld [vmem:[%s1766_s1 + $0x294] ss:$8 sps:$4 sm:$0xff]   ;;  %v1280_v30 = vld [vmem:[%s1766_s1 + $0x290] ss:$8 sps:$4 sm:$0xff]   ;;  %v1300_v35 = vld [vmem:[%s1766_s1 + $0x2c4] ss:$8 sps:$4 sm:$0xff]   ;;  %p1344_p0 = scmp.ne.s32.totalorder %s1018_s19, %s1343_s20  ;;  %p1349_p2 = scmp.lt.s32.totalorder %s1343_s20, %s1343_s20 }
  0x58   :  { %741 = vmatprep.subr.bf16.mxu0 %v1264_v17  ;;  %676 = vmatmul.mubr.bf16.vlgmr.msra.gmra.mrb[0].mxu1 %v1316_v18  ;;  %v1294_v33 = vld [vmem:[%s1766_s1 + $0x2b4] ss:$8 sps:$4 sm:$0xff]   ;;  %v1292_v34 = vld [vmem:[%s1766_s1 + $0x2b0] ss:$8 sps:$4 sm:$0xff]   ;;  %v1298_v36 = vld [vmem:[%s1766_s1 + $0x2c0] ss:$8 sps:$4 sm:$0xff]  }
  0x59   :  { %1144 = vmatpush3.bf16.msra.mxu1 %v1326_v19  ;;  %v1306_v37 = vld [vmem:[%s1766_s1 + $0x2d4] ss:$8 sps:$4 sm:$0xff]   ;;  %v1304_v38 = vld [vmem:[%s1766_s1 + $0x2d0] ss:$8 sps:$4 sm:$0xff]   ;;  %v1312_v39 = vld [vmem:[%s1766_s1 + $0x2e4] ss:$8 sps:$4 sm:$0xff]   ;;  %p1350_p3 = por %p1349_p2, %p1348_p1 }
  0x5a   :  { %1145 = vmatprep.subr.bf16.mxu1 %v1327_v20  ;;  %v1310_v40 = vld [vmem:[%s1766_s1 + $0x2e0] ss:$8 sps:$4 sm:$0xff]   ;;  %v1321_v41 = vld [vmem:[%s1766_s1 + $0x2f4] ss:$8 sps:$4 sm:$0xff]   ;;  %v1319_v42 = vld [vmem:[%s1766_s1 + $0x2f0] ss:$8 sps:$4 sm:$0xff]  }
  0x5b   :  { %742 = vmatpush1.bf16.msra.mxu0 %v1262_v21  ;;  %v1322_v43 = vld [vmem:[%s1765_s0 + $0x10] ss:$24 sps:$4 sm:$0xff]   ;;  %v1331_v44 = vld [vmem:[%s1767_s2 + $0x58] sm:$0xff]   ;;  %v1333_v46 = vld [vmem:[%s1767_s2 + $0x60] sm:$0xff]   ;;  %p1351_p4 = pnand %p1350_p3, %p1344_p0 }
  0x5c   :  { %743 = vmatprep.subr.bf16.mxu0 %v1270_v22  ;;  %v1332_v45 = vld [vmem:[%s1767_s2 + $0x18] sm:$0xff]   ;;  %v1334_v47 = vld [vmem:[%s1767_s2 + $0x20] sm:$0xff]   ;;  %v1335_v48 = vld [vmem:[%s1767_s2 + $0x68] sm:$0xff]  }
  0x5d   :  { %1146 = vmatpush3.bf16.msra.mxu1 %v1328_v23  ;;  %v1336_v49 = vld [vmem:[%s1767_s2 + $0x28] sm:$0xff]   ;;  %v1337_v50 = vld [vmem:[%s1767_s2 + $0x70] sm:$0xff]   ;;  %v1339_v52 = vld [vmem:[%s1767_s2 + $0x78] sm:$0xff]  }
  0x5e   :  { %1147 = vmatprep.subr.bf16.mxu1 %v1329_v24  ;;  %v1338_v51 = vld [vmem:[%s1767_s2 + $0x30] sm:$0xff]   ;;  %v1340_v53 = vld [vmem:[%s1767_s2 + $0x38] sm:$0xff]  }
  0x5f   :  { %744 = vmatpush1.bf16.msra.mxu0 %v1268_v25 }
  0x60   :  { %745 = vmatprep.subr.bf16.mxu0 %v1276_v26 }
  0x61   :  { %1148 = vmatpush3.bf16.msra.mxu1 %v1330_v27 }
  0x62   :  { %1149 = vmatprep.subr.bf16.mxu1 %v1331_v44 }
  0x63   :  { %746 = vmatpush1.bf16.msra.mxu0 %v1274_v28 }
  0x64   :  { %747 = vmatprep.subr.bf16.mxu0 %v1282_v29 }
  0x65   :  { %1150 = vmatpush3.bf16.msra.mxu1 %v1332_v45 }
  0x66   :  { %1151 = vmatprep.subr.bf16.mxu1 %v1333_v46 }
  0x67   :  { %748 = vmatpush1.bf16.msra.mxu0 %v1280_v30 }
  0x68   :  { %749 = vmatprep.subr.bf16.mxu0 %v1288_v31 }
  0x69   :  { %1152 = vmatpush3.bf16.msra.mxu1 %v1334_v47 }
  0x6a   :  { %1153 = vmatprep.subr.bf16.mxu1 %v1335_v48 }
  0x6b   :  { %750 = vmatpush1.bf16.msra.mxu0 %v1286_v32 }
  0x6c   :  { %751 = vmatprep.subr.bf16.mxu0 %v1294_v33 }
  0x6d   :  { %1154 = vmatpush3.bf16.msra.mxu1 %v1336_v49 }
  0x6e   :  { %1155 = vmatprep.subr.bf16.mxu1 %v1337_v50 }
  0x6f   :  { %752 = vmatpush1.bf16.msra.mxu0 %v1292_v34 }
  0x70   :  { %753 = vmatprep.subr.bf16.mxu0 %v1300_v35 }
  0x71   :  { %1156 = vmatpush3.bf16.msra.mxu1 %v1338_v51 }
  0x72   :  { %1157 = vmatprep.subr.bf16.mxu1 %v1339_v52 }
  0x73   :  { %754 = vmatpush1.bf16.msra.mxu0 %v1298_v36  ;;  %v1000_v36 = vlaneseq }
  0x74   :  { %755 = vmatprep.subr.bf16.mxu0 %v1306_v37 }
  0x75   :  { %1158 = vmatpush3.bf16.msra.mxu1 %v1340_v53  ;;  %v1001_v37 = vshrl.u32 %v1000_v36, 7 }
  0x77   :  { %756 = vmatpush1.bf16.msra.mxu0 %v1304_v38  ;;  %v993_v38 = vld [vmem:[%s1768_s3] sm:$0x1] }
  0x78   :  { %757 = vmatprep.subr.bf16.mxu0 %v1312_v39  ;;  %v1002_v39 = vsub.s32 0, %v1001_v37 }
  0x7b   :  { %758 = vmatpush1.bf16.msra.mxu0 %v1310_v40 }
  0x7c   :  { %759 = vmatprep.subr.bf16.mxu0 %v1321_v41 }
  0x7f   :  { %760 = vmatpush1.bf16.msra.mxu0 %v1319_v42  ;;  %v997_v42 = vld [vmem:[%s1768_s3 + $0x1] sm:$0x1] }
  0x82   :  { %762 = vmatmul.mubr.bf16.vlgmr.msra.gmra.mrb[0].mxu0 %v1322_v43 }
 0x12b   :  { %v677_v54 = vpop.f32.mrb[0].mxu1 }
 0x12c   :  { %v679_v55 = vpop.f32.mrb[1].mxu1 }
 0x12d   :  { %v681_v56 = vpop.f32.mrb[2].mxu1 }
 0x12e   :  { %v683_v57 = vpop.f32.mrb[3].mxu1 }
 0x155   :  { %v763_v58 = vpop.f32.mrb[0].mxu0 }
 0x156   :  { %v1165_v59 = vadd.f32 %v763_v58, %v677_v54  ;;  %v765_v60 = vpop.f32.mrb[1].mxu0 }
 0x157   :  { %v1166_v61 = vadd.f32 %v765_v60, %v679_v55  ;;  %v767_v62 = vpop.f32.mrb[2].mxu0 }
 0x158   :  { %v787_v63 = vrot.slane %v1165_v59, 2  ;;  %v769_v0 = vpop.f32.mrb[3].mxu0 }
 0x159   :  { %v788_v1 = vrot.slane %v1166_v61, 2 }
 0x15a   :  { %v791_v2 = vmax.f32 %v1165_v59, %v787_v63 }
 0x15b   :  { %v792_v3 = vmax.f32 %v1166_v61, %v788_v1 }
 0x15c   :  { %v795_v4 = vrot.slane %v791_v2, 4 }
 0x15d   :  { %v796_v5 = vrot.slane %v792_v3, 4 }
 0x15e   :  { %v799_v6 = vmax.f32 %v791_v2, %v795_v4 }
 0x15f   :  { %v800_v7 = vmax.f32 %v792_v3, %v796_v5 }
 0x160   :  { %v801_v8 = vmax.f32 %v799_v6, 0.0 }
 0x161   :  { %v802_v9 = vmax.f32 %v800_v7, 0.0 }
 0x162   :  { %v803_v11 = vpack.c.bf16 %v801_v8, %v801_v8 }
 0x163   :  { %v804_v10 = vpack.c.bf16 %v802_v9, %v802_v9 }
 0x165   :  { %965 = vmatprep.mubr.bf16.mxu1 %v804_v10 }
 0x166   :  { %966 = vmatmul.mubr.bf16.vlgmr.msra.gmra.mrb[4].mxu1 %v803_v11 }
 0x239   :  { %v1159_v12 = vpop.f32.mrb[4].mxu1 }
 0x23a   :  { %v1160_v13 = vpop.f32.mrb[5].mxu1 }
 0x23b   :  { %v1161_v14 = vadd.f32 %v1160_v13, %v1159_v12  ;;  %v1162_v15 = vpop.f32.mrb[6].mxu1 }
 0x23c   :  { %v1163_v16 = vpop.f32.mrb[7].mxu1 }
 0x23d   :  { %v974_v17 = vsel %vm973_vm0, %v1161_v14, 0.0 }
 0x23e   :  { %v975_v18 = vrot.slane %v974_v17, 4 }
 0x240   :  { %v976_v19 = vadd.f32 %v975_v18, %v974_v17 }
 0x242   :  { %v977_v20 = vrot.slane %v976_v19, 2 }
 0x244   :  { %v978_v21 = vadd.f32 %v977_v20, %v976_v19 }
 0x246   :  { %v979_v22 = vrot.slane %v978_v21, 1 }
 0x248   :  { %v980_v23 = vadd.f32 %v979_v22, %v978_v21 }
 0x24a   :  { %v982_v24 = vmul.f32 0.5, %v980_v23 }
 0x24c   :  { %v983_v25 = vsub.f32 %v1161_v14, %v982_v24 }
 0x24e   :  { %v984_v26 = vmul.f32 %v983_v25, %v983_v25 }
 0x250   :  { %v985_v27 = vsel %vm973_vm0, %v984_v26, 0.0 }
 0x251   :  { %v986_v28 = vrot.slane %v985_v27, 4 }
 0x253   :  { %v987_v29 = vadd.f32 %v986_v28, %v985_v27 }
 0x255   :  { %v988_v30 = vrot.slane %v987_v29, 2 }
 0x257   :  { %v989_v31 = vadd.f32 %v988_v30, %v987_v29 }
 0x259   :  { %v990_v32 = vrot.slane %v989_v31, 1 }
 0x25b   :  { %v991_v33 = vadd.f32 %v990_v32, %v989_v31 }
 0x25d   :  { %v992_v34 = vmul.f32 0.5, %v991_v33 }
 0x25f   :  { %v994_v35 = vadd.f32 1e-05, %v992_v34 }
 0x261   :  { %1341 = vrsqrt.f32 %v994_v35 }
 0x26b   :  { %v1342_v40 = vpop.eup %1341 }
 0x26c   :  { %v996_v41 = vmul.f32 %v1342_v40, %v993_v38 }
 0x26e   :  { %v998_v43 = vmul.f32 %v996_v41, %v982_v24  ;;  %v1003_v44 = vrot.slane %v996_v41, %v1002_v39 }
 0x270   :  { %v999_v45 = vsub.f32 %v997_v42, %v998_v43  ;;  %v1004_v46 = vmul.f32 %v1161_v14, %v1003_v44 }
 0x272   :  { %v1008_v47 = vrot.slane %v999_v45, %v1002_v39 }
 0x274   :  { %v1009_v48 = vadd.f32 %v1008_v47, %v1004_v46 }
 0x276   :  { %1010 = vst [vmem:[#allocation3] sm:$0x3] %v1009_v48 }
 0x277   :  { %1354 = shalt.err (!%p1351_p4)
}
 0x278   :  { %s1355_s3 = scalar_lea.hbm %s1769_s4, 32 }
 0x279   :  { %p1356_p5 = scmp.ne.s32.totalorder %s1769_s4, %s1355_s3  ;;  %p1359_p6 = scmp.lt.u32.totalorder %s1355_s3, %s1769_s4 }
 0x27b   :  { %p1361_p7 = pnand %p1359_p6, %p1356_p5 }
 0x27d   :  { %1364 = shalt.err (!%p1361_p7)
}
 0x27e   :  { %1020 = dma.vmem_to_hbm [thread:$0]  %s1018_s19, 32, %s1769_s4, [#allocation4]  }
 0x27f   :  { %1365 = dma.done.wait [#allocation4], 32  }
 0x280   :  { %1366 = vsyncadd [#allocation4], 4294967264 }
 0x281   :  { %1024 = vsyncpa [#allocation4], 1 }

</bundles_post_ra>
